<compile_context>
chip_gen: v5e
topology: v5e:2x2
jax: 0.10.0
libtpu: 0.0.40
codegen_flags: <defaults>
</compile_context>

<pallas_src>
import jax
import jax.numpy as jnp
from jax.experimental import pallas as pl
from jax.experimental.pallas import tpu as pltpu

LANE = 128        # lane width (last-dim granularity)
SUBLANE = 8       # sublane granularity (second-to-last dim, f32)
NEG_BIG = -1e30   # bias for padded classes -> exp() == 0 in the softmax


def _round_up(x, m):
    return (x + m - 1) // m * m


def _vmem_capacity_bytes():
    try:
        return int(pltpu.get_tpu_info().vmem_capacity_bytes)
    except Exception:
        return 128 << 20  # v5e/v6e default if the query is unavailable


def _lr_kernel(x_ref, w_ref, b_ref, o_ref):
    # x_ref: (TB, N) input dtype   w_ref: (N, C_pad) bf16
    # b_ref: (1, C_pad) f32        o_ref: (TB, C_pad) out dtype
    x = x_ref[...].astype(w_ref.dtype)          # in-kernel cast: no host pad/cast pass
    logits = jnp.dot(x, w_ref[...],
                     preferred_element_type=jnp.float32) + b_ref[...]
    # Numerically stable softmax over the class (lane) axis.
    m = jnp.max(logits, axis=-1, keepdims=True)
    e = jnp.exp(logits - m)
    s = jnp.sum(e, axis=-1, keepdims=True)
    # Exact reciprocal: approx=True left row sums off by a few e-3.
    o_ref[...] = (e * (1.0 / s)).astype(o_ref.dtype)


def prepare_params(weight, bias=None, *, compute_dtype=jnp.bfloat16):
    """One-time param prep (hoisted out of the per-call hot path).

    weight: (C, N) in torch.nn.Linear convention; bias: (C,) or None.
    Returns w_t: (N, C_pad) compute_dtype and b: (1, C_pad) f32.  Padded class
    columns are zero and get a very negative bias so they vanish in the softmax.
    The feature dim is NOT padded (the kernel uses full-extent N blocks).
    """
    C, N = weight.shape
    C_pad = _round_up(C, LANE)                      # lane-dense class dim
    w_t = jnp.zeros((N, C_pad), dtype=compute_dtype)
    w_t = w_t.at[:, :C].set(jnp.asarray(weight).T.astype(compute_dtype))
    b = jnp.full((1, C_pad), NEG_BIG, dtype=jnp.float32)
    if bias is None:
        b = b.at[0, :C].set(0.0)
    else:
        b = b.at[0, :C].set(jnp.asarray(bias).astype(jnp.float32))
    return w_t, b


def lr_forward(x, w_t, b, *, n_classes, block_b=4096, out_dtype=jnp.float32,
               vmem_budget_bytes=None, min_grid_steps=2, slice_classes=True):
    """x: (B, N) -> softmax(x @ W^T + b): (B, n_classes) (or (B, C_pad))."""
    B, Nx = x.shape
    N, C_pad = w_t.shape
    if Nx != N:
        raise ValueError(f"x has {Nx} features, weight expects {N}")

    cap = _vmem_capacity_bytes()
    if vmem_budget_bytes is None:
        # ~48 MiB on 128 MiB VMEM chips (v5e/v6e), ~24 MiB on v7x (64 MiB).
        vmem_budget_bytes = (3 * cap) // 8

    x_item = jnp.dtype(x.dtype).itemsize
    out_item = jnp.dtype(out_dtype).itemsize
    w_item = jnp.dtype(w_t.dtype).itemsize
    w_bytes = N * C_pad * w_item + C_pad * 4
    per_row = 2 * (N * x_item + C_pad * out_item)   # double-buffered x & out tiles

    # Budget the resident weight conservatively (x2) so we stay safe even if
    # the single-buffer request below is not honored.
    tb_cap = (vmem_budget_bytes - 2 * w_bytes) // per_row
    tb_cap = (tb_cap // SUBLANE) * SUBLANE
    if tb_cap < SUBLANE:
        # TODO(synk): class-tiled online-softmax path instead of resident W.
        raise ValueError("resident weight does not fit the VMEM budget; "
                         "a class-tiled variant is required for this size")

    # Keep >= min_grid_steps grid steps so v7x's two TensorCores both get work.
    tb_from_batch = _round_up(max(pl.cdiv(B, max(min_grid_steps, 1)), 1), SUBLANE)
    TB = min(block_b, tb_cap, tb_from_batch)
    TB = max(SUBLANE, (TB // SUBLANE) * SUBLANE)

    grid = (pl.cdiv(B, TB),)   # ragged last tile handled by Pallas

    vmem_limit = int(min(max(2 * (w_bytes + TB * per_row), 32 << 20),
                         (3 * cap) // 4))

    def _call(single_buffer_resident):
        res_kw = ({"pipeline_mode": pl.Buffered(1)}
                  if single_buffer_resident else {})
        return pl.pallas_call(
            _lr_kernel,
            out_shape=jax.ShapeDtypeStruct((B, C_pad), out_dtype),
            grid_spec=pltpu.PrefetchScalarGridSpec(
                num_scalar_prefetch=0,
                grid=grid,
                in_specs=[
                    # x tiles: full-extent feature dim (== array dim) -> no padding.
                    pl.BlockSpec((TB, N), lambda i: (i, 0)),
                    # Resident weight / bias (constant index_map).
                    pl.BlockSpec((N, C_pad), lambda i: (0, 0), **res_kw),
                    pl.BlockSpec((1, C_pad), lambda i: (0, 0), **res_kw),
                ],
                out_specs=pl.BlockSpec((TB, C_pad), lambda i: (i, 0)),
            ),
            compiler_params=pltpu.CompilerParams(
                dimension_semantics=("parallel",),
                vmem_limit_bytes=vmem_limit,
            ),
        )(x, w_t, b)

    try:
        out = _call(True)
    except Exception:
        # Fallback if pl.Buffered(1) is rejected by this JAX/Mosaic version.
        out = _call(False)

    if slice_classes:
        return out[:, :n_classes]
    return out


def reference(x, weight, bias, compute_dtype=jnp.bfloat16):
    # Mirror the kernel's bf16 quantization of x and W; f32 accumulate/softmax.
    xq = x.astype(compute_dtype).astype(jnp.float32)
    wq = weight.astype(compute_dtype).astype(jnp.float32)
    logits = xq @ wq.T
    if bias is not None:
        logits = logits + bias.astype(jnp.float32)
    return jax.nn.softmax(logits, axis=1)


def _check(B, N, C, key, block_b=4096):
    k_x, k_w, k_b = jax.random.split(key, 3)
    x = jax.random.normal(k_x, (B, N), dtype=jnp.float32)
    bound = 1.0 / (N ** 0.5)
    weight = jax.random.uniform(k_w, (C, N), minval=-bound, maxval=bound,
                                dtype=jnp.float32)
    bias = jax.random.uniform(k_b, (C,), minval=-bound, maxval=bound,
                              dtype=jnp.float32)

    w_t, b2d = prepare_params(weight, bias)
    out = lr_forward(x, w_t, b2d, n_classes=C, block_b=block_b)
    out = jax.block_until_ready(out)

    ref = reference(x, weight, bias)
    assert out.shape == (B, C)
    assert jnp.allclose(out, ref, atol=1e-3, rtol=1e-3), "mismatch vs reference"
    assert jnp.allclose(jnp.sum(out, axis=1), 1.0, atol=1e-3), \
        "rows must sum to 1"


if __name__ == "__main__":
    key = jax.random.PRNGKey(0)
    k0, k1 = jax.random.split(key)

    # Toy size matching the original module usage (semantics check).
    _check(B=8, N=32, C=10, key=k0)

    # Ragged multi-tile case: grid of 4 with a partial last tile, non-multiple
    # feature/class dims, lane-dense padded output sliced back to (B, C).
    _check(B=200, N=300, C=37, key=k1, block_b=64)

    print("KERNEL_OK")
</pallas_src>

<mosaic_0001>
module attributes {stable_mosaic.version = 11 : i64} {
  func.func @_lr_kernel(%arg0: i32, %arg1: memref<8x32xf32, #tpu.memory_space<vmem>>, %arg2: memref<32x128xbf16, #tpu.memory_space<vmem>>, %arg3: memref<1x128xf32, #tpu.memory_space<vmem>>, %arg4: memref<8x128xf32, #tpu.memory_space<vmem>>) attributes {dimension_semantics = [#tpu.dimension_semantics<parallel>], iteration_bounds = array<i64: 1>, scalar_prefetch = 0 : i64, scratch_operands = 0 : i64, tpu.core_type = #tpu.core_type<tc>, window_params = [{transform_indices = @transform_0, window_bounds = array<i64: 8, 32>}, {pipeline_mode = #tpu.pipeline_mode<synchronous>, transform_indices = @transform_1, window_bounds = array<i64: 32, 128>}, {pipeline_mode = #tpu.pipeline_mode<synchronous>, transform_indices = @transform_2, window_bounds = array<i64: 1, 128>}, {transform_indices = @transform_3, window_bounds = array<i64: 8, 128>}]} {
    %c0 = arith.constant 0 : index
    %c0_0 = arith.constant 0 : index
    %0 = vector.load %arg1[%c0, %c0_0] : memref<8x32xf32, #tpu.memory_space<vmem>>, vector<8x32xf32>
    %1 = arith.truncf %0 : vector<8x32xf32> to vector<8x32xbf16>
    %c0_1 = arith.constant 0 : index
    %c0_2 = arith.constant 0 : index
    %2 = vector.load %arg2[%c0_1, %c0_2] : memref<32x128xbf16, #tpu.memory_space<vmem>>, vector<32x128xbf16>
    %cst = arith.constant dense<0.000000e+00> : vector<8x128xf32>
    %3 = tpu.matmul %1, %2, %cst {dimension_numbers = #tpu.dot_dimension_numbers<[1], [0], [0], [1], [0, 0, 1, 1], [], []>} : vector<8x32xbf16>, vector<32x128xbf16>, vector<8x128xf32> -> vector<8x128xf32>
    %c0_3 = arith.constant 0 : index
    %c0_4 = arith.constant 0 : index
    %4 = vector.load %arg3[%c0_3, %c0_4] : memref<1x128xf32, #tpu.memory_space<vmem>>, vector<1x128xf32>
    %5 = vector.broadcast %4 : vector<1x128xf32> to vector<8x128xf32>
    %6 = arith.addf %3, %5 : vector<8x128xf32>
    %cst_5 = arith.constant dense<0xFF800000> : vector<8xf32>
    %7 = vector.multi_reduction <maximumf>, %6, %cst_5 [1] : vector<8x128xf32> to vector<8xf32>
    %8 = vector.shape_cast %7 : vector<8xf32> to vector<8x1xf32>
    %9 = vector.broadcast %8 : vector<8x1xf32> to vector<8x128xf32>
    %10 = arith.subf %6, %9 : vector<8x128xf32>
    %11 = math.exp %10 : vector<8x128xf32>
    %cst_6 = arith.constant dense<0.000000e+00> : vector<8xf32>
    %12 = vector.multi_reduction <add>, %11, %cst_6 [1] : vector<8x128xf32> to vector<8xf32>
    %13 = vector.shape_cast %12 : vector<8xf32> to vector<8x1xf32>
    %cst_7 = arith.constant 1.000000e+00 : f32
    %14 = vector.broadcast %cst_7 : f32 to vector<8x1xf32>
    %15 = arith.divf %14, %13 : vector<8x1xf32>
    %16 = vector.broadcast %15 : vector<8x1xf32> to vector<8x128xf32>
    %17 = arith.mulf %11, %16 : vector<8x128xf32>
    %c0_8 = arith.constant 0 : index
    %c0_9 = arith.constant 0 : index
    %18 = vector.load %arg4[%c0_8, %c0_9] : memref<8x128xf32, #tpu.memory_space<vmem>>, vector<8x128xf32>
    tpu.vector_store %arg4[%c0_8, %c0_9], %17 {strides = array<i32>} : memref<8x128xf32, #tpu.memory_space<vmem>>, vector<8x128xf32>,
    return
  }
  func.func @transform_0(%arg0: i32) -> (i32, i32) {
    %c0_i32 = arith.constant 0 : i32
    %c0_i32_0 = arith.constant 0 : i32
    return %arg0, %c0_i32 : i32, i32
  }
  func.func @transform_1(%arg0: i32) -> (i32, i32) {
    %c0_i32 = arith.constant 0 : i32
    %c0_i32_0 = arith.constant 0 : i32
    %c0_i32_1 = arith.constant 0 : i32
    return %c0_i32, %c0_i32_0 : i32, i32
  }
  func.func @transform_2(%arg0: i32) -> (i32, i32) {
    %c0_i32 = arith.constant 0 : i32
    %c0_i32_0 = arith.constant 0 : i32
    %c0_i32_1 = arith.constant 0 : i32
    return %c0_i32, %c0_i32_0 : i32, i32
  }
  func.func @transform_3(%arg0: i32) -> (i32, i32) {
    %c0_i32 = arith.constant 0 : i32
    %c0_i32_0 = arith.constant 0 : i32
    return %arg0, %c0_i32 : i32, i32
  }
}

module attributes {stable_mosaic.version = 11 : i64} {
  func.func @_lr_kernel(%arg0: i32, %arg1: memref<8x32xf32, #tpu.memory_space<vmem>>, %arg2: memref<32x128xbf16, #tpu.memory_space<vmem>>, %arg3: memref<1x128xf32, #tpu.memory_space<vmem>>, %arg4: memref<8x128xf32, #tpu.memory_space<vmem>>) attributes {dimension_semantics = [#tpu.dimension_semantics<parallel>], iteration_bounds = array<i64: 1>, scalar_prefetch = 0 : i64, scratch_operands = 0 : i64, tpu.core_type = #tpu.core_type<tc>, window_params = [{transform_indices = @transform_0, window_bounds = array<i64: 8, 32>}, {pipeline_mode = #tpu.pipeline_mode<synchronous>, transform_indices = @transform_1, window_bounds = array<i64: 32, 128>}, {pipeline_mode = #tpu.pipeline_mode<synchronous>, transform_indices = @transform_2, window_bounds = array<i64: 1, 128>}, {transform_indices = @transform_3, window_bounds = array<i64: 8, 128>}]} {
    %c0 = arith.constant 0 : index
    %c0_0 = arith.constant 0 : index
    %0 = vector.load %arg1[%c0, %c0_0] : memref<8x32xf32, #tpu.memory_space<vmem>>, vector<8x32xf32>
    %1 = arith.truncf %0 : vector<8x32xf32> to vector<8x32xbf16>
    %c0_1 = arith.constant 0 : index
    %c0_2 = arith.constant 0 : index
    %2 = vector.load %arg2[%c0_1, %c0_2] : memref<32x128xbf16, #tpu.memory_space<vmem>>, vector<32x128xbf16>
    %cst = arith.constant dense<0.000000e+00> : vector<8x128xf32>
    %3 = tpu.matmul %1, %2, %cst {dimension_numbers = #tpu.dot_dimension_numbers<[1], [0], [0], [1], [0, 0, 1, 1], [], []>} : vector<8x32xbf16>, vector<32x128xbf16>, vector<8x128xf32> -> vector<8x128xf32>
    %c0_3 = arith.constant 0 : index
    %c0_4 = arith.constant 0 : index
    %4 = vector.load %arg3[%c0_3, %c0_4] : memref<1x128xf32, #tpu.memory_space<vmem>>, vector<1x128xf32>
    %5 = vector.broadcast %4 : vector<1x128xf32> to vector<8x128xf32>
    %6 = arith.addf %3, %5 : vector<8x128xf32>
    %cst_5 = arith.constant dense<0xFF800000> : vector<8xf32>
    %7 = vector.multi_reduction <maximumf>, %6, %cst_5 [1] : vector<8x128xf32> to vector<8xf32>
    %8 = vector.shape_cast %7 : vector<8xf32> to vector<8x1xf32>
    %9 = vector.broadcast %8 : vector<8x1xf32> to vector<8x128xf32>
    %10 = arith.subf %6, %9 : vector<8x128xf32>
    %11 = math.exp %10 : vector<8x128xf32>
    %cst_6 = arith.constant dense<0.000000e+00> : vector<8xf32>
    %12 = vector.multi_reduction <add>, %11, %cst_6 [1] : vector<8x128xf32> to vector<8xf32>
    %13 = vector.shape_cast %12 : vector<8xf32> to vector<8x1xf32>
    %cst_7 = arith.constant 1.000000e+00 : f32
    %14 = vector.broadcast %cst_7 : f32 to vector<8x1xf32>
    %15 = arith.divf %14, %13 : vector<8x1xf32>
    %16 = vector.broadcast %15 : vector<8x1xf32> to vector<8x128xf32>
    %17 = arith.mulf %11, %16 : vector<8x128xf32>
    %c0_8 = arith.constant 0 : index
    %c0_9 = arith.constant 0 : index
    %18 = vector.load %arg4[%c0_8, %c0_9] : memref<8x128xf32, #tpu.memory_space<vmem>>, vector<8x128xf32>
    tpu.vector_store %arg4[%c0_8, %c0_9], %17 {strides = array<i32>} : memref<8x128xf32, #tpu.memory_space<vmem>>, vector<8x128xf32>,
    return
  }
  func.func @transform_0(%arg0: i32) -> (i32, i32) {
    %c0_i32 = arith.constant 0 : i32
    %c0_i32_0 = arith.constant 0 : i32
    return %arg0, %c0_i32 : i32, i32
  }
  func.func @transform_1(%arg0: i32) -> (i32, i32) {
    %c0_i32 = arith.constant 0 : i32
    %c0_i32_0 = arith.constant 0 : i32
    %c0_i32_1 = arith.constant 0 : i32
    return %c0_i32, %c0_i32_0 : i32, i32
  }
  func.func @transform_2(%arg0: i32) -> (i32, i32) {
    %c0_i32 = arith.constant 0 : i32
    %c0_i32_0 = arith.constant 0 : i32
    %c0_i32_1 = arith.constant 0 : i32
    return %c0_i32, %c0_i32_0 : i32, i32
  }
  func.func @transform_3(%arg0: i32) -> (i32, i32) {
    %c0_i32 = arith.constant 0 : i32
    %c0_i32_0 = arith.constant 0 : i32
    return %arg0, %c0_i32 : i32, i32
  }
}

</mosaic_0001>

<bundles_post_ra>
// kernel: tpu_custom_call.1
= control target key start
LH: loop header
LB: loop body
LE: loop exit
PB: predicated region body
PF: predicated region fallthrough
CT: control target
= control target key end

     0   :  { %8 = vsyncpa [#allocation3], 0  ;;  %s263_s0 = inlined_call_operand.hbm [shape: f32[8,32], index: 0, kind: input, shape index: {}]   ;;  %s264_s1 = inlined_call_operand.hbm [shape: bf16[32,128], index: 1, kind: input, shape index: {}]   ;;  %s265_s2 = inlined_call_operand.vmem [shape: f32[1,128], index: 2, kind: input, shape index: {}]   ;;  %s266_s3 = inlined_call_operand.hbm [shape: f32[8,128], index: 3, kind: output, shape index: {}]  }
   0x1   :  { %9 = vsyncpa [#allocation6], 0 }
   0x2   :  { %10 = vsyncpa [#allocation4], 0  ;;  %s16_s14 = sshll.u32 %s263_s0, 4  ;;  %s226_s15 = smov [#allocation2]   ;;  %s17_s14 = int_to_ptr.hbm [resolvable:$true] %s16_s14 }
   0x3   :  { %s18_s16 = sshll.u32 %s226_s15, 4  ;;  %s26_s19 = sshll.u32 %s264_s1, 4  ;;  %s19_s16 = int_to_ptr.vmem [resolvable:$true] %s18_s16  ;;  %s27_s19 = int_to_ptr.hbm [resolvable:$true] %s26_s19 }
   0x4   :  { %21 = dma.hbm_to_vmem [thread:$0]  %s17_s14, 128, %s19_s16, [#allocation3]  }
   0x5   :  { %s227_s20 = smov [#allocation5]   ;;  %s228_s22 = smov 64  }
   0x6   :  { %s28_s21 = sshll.u32 %s227_s20, 4  ;;  %s229_s23 = smov 4   ;;  %s29_s21 = int_to_ptr.vmem [resolvable:$true] %s28_s21 }
   0x7   :  { %34 = dma.hbm_to_vmem [thread:$0]  %s27_s19, 256, %s29_s21, [#allocation6], %s228_s22, %s228_s22, %s229_s23  }
   0x8   :  { %220 = dma.done.wait [#allocation3], 128  }
   0x9   :  { %221 = vsyncadd [#allocation3], 4294967168 }
   0xa   :  { %222 = dma.done.wait [#allocation6], 256  }
   0xb   :  { %223 = vsyncadd [#allocation6], 4294967040  ;;  %v137_v0 = vld [vmem:[#allocation5 + $0x8] sm:$0xff]  ;;  %v136_v1 = vld [vmem:[#allocation5] sm:$0xff]  ;;  %vm68_vm0 = vcmask 261120   ;;  %s116_s27 = sshll.u32 %s266_s3, 4  ;;  %s117_s27 = int_to_ptr.hbm [resolvable:$true] %s116_s27 }
   0xc   :  { %78 = vmatpush.bf16.msra.mxu0 %v137_v0  ;;  %v46_v2 = vld [vmem:[#allocation2] sm:$0xff] }
   0xd   :  { %v47_v3 = vpack.c.bf16 %v46_v2, %v46_v2  ;;  %v143_v4 = vld [vmem:[%s265_s2] ss:$0 sm:$0xff]  ;;  %s230_s2 = smov [#allocation7]  }
   0xe   :  { %s114_s24 = sshll.u32 %s230_s2, 4  ;;  %s115_s24 = int_to_ptr.vmem [resolvable:$true] %s114_s24 }
  0x10   :  { %79 = vmatpush.bf16.msra.mxu0 %v136_v1 }
  0x13   :  { %135 = vmatmul.msk.bf16.vlgmr.msra.gmra.mxu0 %vm68_vm0, %v47_v3 }
  0x90   :  { %v81_v5 = vpop.f32.mrf.mxu0 }
  0x91   :  { %v82_v6 = vadd.f32 %v143_v4, %v81_v5 }
  0x93   :  { %85 = vmax.xlane.f32.xlu0 %v82_v6 }
  0x98   :  { %v83_v7 = vpop.f32.mrf.mxu0 }
 0x106   :  { %v86_v8 = vpop.xlane.xlu0 %85 }
 0x107   :  { %v87_v9 = vsub.f32 %v82_v6, %v86_v8 }
 0x109   :  { %v88_v10 = vmul.f32 1.442695, %v87_v9 }
 0x10b   :  { %144 = vpow2.f32 %v88_v10 }
 0x111   :  { %v145_v11 = vpop.eup %144 }
 0x112   :  { %90 = vadd.xlane.f32.xlu0 %v145_v11 }
 0x185   :  { %v91_v12 = vpop.xlane.xlu0 %90 }
 0x186   :  { %146 = vrcp.f32 %v91_v12  ;;  %v103_v16 = vand.u32 2147483648, %v91_v12  ;;  %v101_v18 = vand.u32 2147483647, %v91_v12  ;;  %vm97_vm2 = vweird.f32 %v91_v12 }
 0x188   :  { %v104_v20 = vor.u32 1.1754944e-38, %v103_v16  ;;  %vm102_vm4 = vcmp.eq.f32.partialorder %v101_v18, 8.507059e+37 }
 0x18c   :  { %v147_v13 = vpop.eup %146 }
 0x18d   :  { %v93_v14 = vmul.f32 %v147_v13, %v91_v12  ;;  %vm98_vm1 = vweird.f32 %v147_v13 }
 0x18e   :  { %vm99_vm3 = vmor %vm97_vm2, %vm98_vm1 }
 0x18f   :  { %v94_v15 = vsub.f32 1.0, %v93_v14 }
 0x191   :  { %v95_v17 = vmul.f32 %v147_v13, %v94_v15 }
 0x193   :  { %v96_v19 = vadd.f32 %v147_v13, %v95_v17 }
 0x195   :  { %v100_v21 = vsel %vm99_vm3, %v147_v13, %v96_v19 }
 0x196   :  { %v105_v22 = vsel %vm102_vm4, %v104_v20, %v100_v21 }
 0x197   :  { %v107_v23 = vmul.f32 %v145_v11, %v105_v22 }
 0x199   :  { %108 = vst [vmem:[#allocation7] sm:$0xff] %v107_v23 }
 0x19a   :  { %119 = dma.vmem_to_hbm [thread:$0]  %s115_s24, 128, %s117_s27, [#allocation4]  }
 0x19b   :  { %224 = dma.done.wait [#allocation4], 128  }
 0x19c   :  { %225 = vsyncadd [#allocation4], 4294967168 }
 0x19d   :  { %124 = vsyncpa [#allocation3], 1 }
 0x19e   :  { %125 = vsyncpa [#allocation6], 1 }
 0x19f   :  { %126 = vsyncpa [#allocation4], 1 }

// kernel: tpu_custom_call.1
= control target key start
LH: loop header
LB: loop body
LE: loop exit
PB: predicated region body
PF: predicated region fallthrough
CT: control target
= control target key end

     0   :  { %8 = vsyncpa [#allocation3], 0  ;;  %s263_s0 = inlined_call_operand.hbm [shape: f32[8,32], index: 0, kind: input, shape index: {}]   ;;  %s264_s1 = inlined_call_operand.hbm [shape: bf16[32,128], index: 1, kind: input, shape index: {}]   ;;  %s265_s2 = inlined_call_operand.vmem [shape: f32[1,128], index: 2, kind: input, shape index: {}]   ;;  %s266_s3 = inlined_call_operand.hbm [shape: f32[8,128], index: 3, kind: output, shape index: {}]  }
   0x1   :  { %9 = vsyncpa [#allocation6], 0 }
   0x2   :  { %10 = vsyncpa [#allocation4], 0  ;;  %s16_s14 = sshll.u32 %s263_s0, 4  ;;  %s226_s15 = smov [#allocation2]   ;;  %s17_s14 = int_to_ptr.hbm [resolvable:$true] %s16_s14 }
   0x3   :  { %s18_s16 = sshll.u32 %s226_s15, 4  ;;  %s26_s19 = sshll.u32 %s264_s1, 4  ;;  %s19_s16 = int_to_ptr.vmem [resolvable:$true] %s18_s16  ;;  %s27_s19 = int_to_ptr.hbm [resolvable:$true] %s26_s19 }
   0x4   :  { %21 = dma.hbm_to_vmem [thread:$0]  %s17_s14, 128, %s19_s16, [#allocation3]  }
   0x5   :  { %s227_s20 = smov [#allocation5]   ;;  %s228_s22 = smov 64  }
   0x6   :  { %s28_s21 = sshll.u32 %s227_s20, 4  ;;  %s229_s23 = smov 4   ;;  %s29_s21 = int_to_ptr.vmem [resolvable:$true] %s28_s21 }
   0x7   :  { %34 = dma.hbm_to_vmem [thread:$0]  %s27_s19, 256, %s29_s21, [#allocation6], %s228_s22, %s228_s22, %s229_s23  }
   0x8   :  { %220 = dma.done.wait [#allocation3], 128  }
   0x9   :  { %221 = vsyncadd [#allocation3], 4294967168 }
   0xa   :  { %222 = dma.done.wait [#allocation6], 256  }
   0xb   :  { %223 = vsyncadd [#allocation6], 4294967040  ;;  %v137_v0 = vld [vmem:[#allocation5 + $0x8] sm:$0xff]  ;;  %v136_v1 = vld [vmem:[#allocation5] sm:$0xff]  ;;  %vm68_vm0 = vcmask 261120   ;;  %s116_s27 = sshll.u32 %s266_s3, 4  ;;  %s117_s27 = int_to_ptr.hbm [resolvable:$true] %s116_s27 }
   0xc   :  { %78 = vmatpush.bf16.msra.mxu0 %v137_v0  ;;  %v46_v2 = vld [vmem:[#allocation2] sm:$0xff] }
   0xd   :  { %v47_v3 = vpack.c.bf16 %v46_v2, %v46_v2  ;;  %v143_v4 = vld [vmem:[%s265_s2] ss:$0 sm:$0xff]  ;;  %s230_s2 = smov [#allocation7]  }
   0xe   :  { %s114_s24 = sshll.u32 %s230_s2, 4  ;;  %s115_s24 = int_to_ptr.vmem [resolvable:$true] %s114_s24 }
  0x10   :  { %79 = vmatpush.bf16.msra.mxu0 %v136_v1 }
  0x13   :  { %135 = vmatmul.msk.bf16.vlgmr.msra.gmra.mxu0 %vm68_vm0, %v47_v3 }
  0x90   :  { %v81_v5 = vpop.f32.mrf.mxu0 }
  0x91   :  { %v82_v6 = vadd.f32 %v143_v4, %v81_v5 }
  0x93   :  { %85 = vmax.xlane.f32.xlu0 %v82_v6 }
  0x98   :  { %v83_v7 = vpop.f32.mrf.mxu0 }
 0x106   :  { %v86_v8 = vpop.xlane.xlu0 %85 }
 0x107   :  { %v87_v9 = vsub.f32 %v82_v6, %v86_v8 }
 0x109   :  { %v88_v10 = vmul.f32 1.442695, %v87_v9 }
 0x10b   :  { %144 = vpow2.f32 %v88_v10 }
 0x111   :  { %v145_v11 = vpop.eup %144 }
 0x112   :  { %90 = vadd.xlane.f32.xlu0 %v145_v11 }
 0x185   :  { %v91_v12 = vpop.xlane.xlu0 %90 }
 0x186   :  { %146 = vrcp.f32 %v91_v12  ;;  %v103_v16 = vand.u32 2147483648, %v91_v12  ;;  %v101_v18 = vand.u32 2147483647, %v91_v12  ;;  %vm97_vm2 = vweird.f32 %v91_v12 }
 0x188   :  { %v104_v20 = vor.u32 1.1754944e-38, %v103_v16  ;;  %vm102_vm4 = vcmp.eq.f32.partialorder %v101_v18, 8.507059e+37 }
 0x18c   :  { %v147_v13 = vpop.eup %146 }
 0x18d   :  { %v93_v14 = vmul.f32 %v147_v13, %v91_v12  ;;  %vm98_vm1 = vweird.f32 %v147_v13 }
 0x18e   :  { %vm99_vm3 = vmor %vm97_vm2, %vm98_vm1 }
 0x18f   :  { %v94_v15 = vsub.f32 1.0, %v93_v14 }
 0x191   :  { %v95_v17 = vmul.f32 %v147_v13, %v94_v15 }
 0x193   :  { %v96_v19 = vadd.f32 %v147_v13, %v95_v17 }
 0x195   :  { %v100_v21 = vsel %vm99_vm3, %v147_v13, %v96_v19 }
 0x196   :  { %v105_v22 = vsel %vm102_vm4, %v104_v20, %v100_v21 }
 0x197   :  { %v107_v23 = vmul.f32 %v145_v11, %v105_v22 }
 0x199   :  { %108 = vst [vmem:[#allocation7] sm:$0xff] %v107_v23 }
 0x19a   :  { %119 = dma.vmem_to_hbm [thread:$0]  %s115_s24, 128, %s117_s27, [#allocation4]  }
 0x19b   :  { %224 = dma.done.wait [#allocation4], 128  }
 0x19c   :  { %225 = vsyncadd [#allocation4], 4294967168 }
 0x19d   :  { %124 = vsyncpa [#allocation3], 1 }
 0x19e   :  { %125 = vsyncpa [#allocation6], 1 }
 0x19f   :  { %126 = vsyncpa [#allocation4], 1 }

</bundles_post_ra>
